<compile_context>
chip_gen: v6e
topology: v6e:2x2x1
jax: 0.10.0
libtpu: 0.0.40
codegen_flags: <defaults>
</compile_context>

<pallas_src>
import jax
import jax.numpy as jnp
from jax.experimental import pallas as pl
from jax.experimental.pallas import tpu as pltpu


def _round_up(x, m):
    return ((x + m - 1) // m) * m


def classblock_kernel(x_ref, w_ref, b_ref, logits_ref, f_ref, xb_ref):
    """One (batch-tile i, class-tile j) grid step.  j is the inner axis.

    x_ref:      (TM, Dp)  f32 input tile (constant along j)
    w_ref:      (Dp, TC)  bf16 pre-transposed weight tile
    b_ref:      (1,  TC)  f32 bias tile
    logits_ref: (TM, TC)  f32 logits tile
    f_ref:      (TM, Dp)  f32 L2-normalized features (out-block constant along j)
    xb_ref:     (TM, Dp)  bf16 scratch: x cast once per batch tile
    """
    j = pl.program_id(1)

    # Per-batch-tile work: L2 normalization + the f32->bf16 cast of x are done
    # once per batch tile (the f out-block and x in-block do not change with j).
    @pl.when(j == 0)
    def _():
        x = x_ref[...]                                            # f32
        sq_sum = jnp.sum(x * x, axis=1, keepdims=True)            # (TM, 1)
        inv_norm = pl.reciprocal(jnp.sqrt(sq_sum) + 1e-8, approx=False)
        f_ref[...] = (x * inv_norm).astype(f_ref.dtype)
        xb_ref[...] = x.astype(xb_ref.dtype)                      # bf16 for MXU

    # Classifier. Dropout(p=0.5) is identity in eval mode.
    # TODO(synk): training-mode dropout (pltpu.prng_seed/prng_random_bits mask
    #             + 1/(1-p) scale) is not implemented.
    logits = jnp.dot(xb_ref[...], w_ref[...], preferred_element_type=jnp.float32)
    logits_ref[...] = (logits + b_ref[...]).astype(logits_ref.dtype)


def prepare_classifier_params(weight, bias, mxu_dtype=jnp.bfloat16):
    """One-time re-layout of the classifier parameters.

    weight: (C, D) PyTorch nn.Linear layout -> returns (D_pad, C_pad) bf16,
    transposed and zero-padded; bias -> (1, C_pad) f32.  Cache the result and
    pass it via `prepared=` to avoid a per-call transpose/cast/pad of W.
    """
    C, D = weight.shape
    D_pad = _round_up(D, 128)
    C_pad = _round_up(C, 128)
    wp = jnp.pad(weight.T.astype(mxu_dtype), ((0, D_pad - D), (0, C_pad - C)))
    bp = jnp.pad(bias.astype(jnp.float32), (0, C_pad - C)).reshape(1, C_pad)
    return wp, bp, (D, C)


def class_block_forward(x, weight=None, bias=None, *, prepared=None,
                        tm=None, tc=None, mxu_dtype=jnp.bfloat16):
    """ClassBlock forward (eval mode).

    x:      (B, D) float32
    weight: (C, D) float32   (PyTorch nn.Linear layout)   -- or pass `prepared`
    bias:   (C,)   float32
    returns (logits (B, C) f32, f (B, D) f32)
    """
    if prepared is None:
        prepared = prepare_classifier_params(weight, bias, mxu_dtype)
    wp, bp, (D, C) = prepared
    B = x.shape[0]
    assert x.shape[1] == D
    D_pad = wp.shape[0]
    w_itemsize = jnp.dtype(wp.dtype).itemsize

    # ---- tile choices -------------------------------------------------------
    if tc is None:
        # Single class tile whenever the double-buffered weight fits ~24 MiB:
        # the W block index is then constant across the whole grid -> the
        # weight is DMA'd from HBM exactly once per core.
        if 2 * D_pad * wp.shape[1] * w_itemsize <= (24 << 20):
            tc = wp.shape[1]
        else:
            tc = ((24 << 20) // (2 * D_pad * w_itemsize)) // 128 * 128
            tc = int(min(max(tc, 128), wp.shape[1]))

    if tm is None:
        B16 = _round_up(max(B, 16), 16)       # bf16 LHS packs 16 rows / vreg
        if B16 >= 256:
            # >= 2 batch tiles so the "parallel" axis can shard across v7x's
            # two TensorCores; cap at 256 for MXU-friendly bursts.
            tm = min(256, _round_up(pl.cdiv(B16, 2), 16))
        else:
            tm = B16

    B_pad = _round_up(B, tm)
    C_pad = _round_up(wp.shape[1], tc)
    if C_pad != wp.shape[1]:                  # only if a custom tc forces it
        wp = jnp.pad(wp, ((0, 0), (0, C_pad - wp.shape[1])))
        bp = jnp.pad(bp, ((0, 0), (0, C_pad - bp.shape[1])))

    # ---- pad x --------------------------------------------------------------
    xp = jnp.pad(x.astype(jnp.float32), ((0, B_pad - B), (0, D_pad - D)))

    grid = (B_pad // tm, C_pad // tc)
    n_bt, n_ct = grid

    # ---- VMEM budget (tiles already include double buffering) ---------------
    vmem_bytes = (
        2 * tm * D_pad * 4             # x tile (in)
        + 2 * D_pad * tc * w_itemsize  # weight tile (in)
        + 2 * 8 * tc * 4               # bias tile (padded to 8 sublanes)
        + 2 * tm * tc * 4              # logits tile (out)
        + 2 * tm * D_pad * 4           # f tile (out)
        + tm * D_pad * 2               # bf16 x scratch
    )
    # Cap at 48 MiB: leaves headroom under v7x's 64 MiB physical VMEM.
    vmem_limit = int(min(max(vmem_bytes + (2 << 20), 8 << 20), 48 << 20))

    w_hbm_bytes = wp.size * w_itemsize * (1 if n_ct == 1 else n_bt)
    cost = pl.CostEstimate(
        flops=2 * B_pad * D_pad * C_pad,
        transcendentals=2 * B_pad,                # sqrt + reciprocal per row
        bytes_accessed=(xp.size * 4 + w_hbm_bytes + bp.size * 4
                        + B_pad * C_pad * 4 + B_pad * D_pad * 4),
    )

    logits_p, f_p = pl.pallas_call(
        classblock_kernel,
        out_shape=(
            jax.ShapeDtypeStruct((B_pad, C_pad), jnp.float32),
            jax.ShapeDtypeStruct((B_pad, D_pad), jnp.float32),
        ),
        grid_spec=pltpu.PrefetchScalarGridSpec(
            num_scalar_prefetch=0,
            grid=grid,
            in_specs=[
                pl.BlockSpec((tm, D_pad), lambda i, j: (i, 0)),   # x: per batch tile
                pl.BlockSpec((D_pad, tc), lambda i, j: (0, j)),   # W
                pl.BlockSpec((1, tc),     lambda i, j: (0, j)),   # bias
            ],
            out_specs=[
                pl.BlockSpec((tm, tc),    lambda i, j: (i, j)),   # logits
                pl.BlockSpec((tm, D_pad), lambda i, j: (i, 0)),   # f (const along j)
            ],
            scratch_shapes=[pltpu.VMEM((tm, D_pad), mxu_dtype)],  # cached bf16 x
        ),
        compiler_params=pltpu.CompilerParams(
            # batch tiles independent -> megacore parallel on v7x;
            # class-tile axis keeps the f out-block resident -> arbitrary.
            dimension_semantics=("parallel", "arbitrary"),
            vmem_limit_bytes=vmem_limit,
        ),
        cost_estimate=cost,
    )(xp, wp, bp)

    return logits_p[:B, :C], f_p[:B, :D]


def reference_forward(x, weight, bias):
    """Pure-JAX reference matching the PyTorch module semantics (eval mode)."""
    norm = jnp.sqrt(jnp.sum(x * x, axis=1, keepdims=True)) + 1e-8
    f = x / norm
    logits = jnp.dot(x, weight.T, precision=jax.lax.Precision.HIGHEST) + bias[None, :]
    return logits, f


if __name__ == "__main__":
    # Small shapes consistent with the module (input_dim -> D, class_num -> C),
    # deliberately non-aligned to exercise the padding paths.
    B, D, C = 40, 96, 300

    key = jax.random.PRNGKey(0)
    kx, kw = jax.random.split(key)

    x = jax.random.normal(kx, (B, D), dtype=jnp.float32)

    # weights_init_classifier: Linear.weight ~ Normal(std=0.001), bias = 0.
    w = 0.001 * jax.random.normal(kw, (C, D), dtype=jnp.float32)
    b = jnp.zeros((C,), dtype=jnp.float32)

    ref_logits, ref_f = reference_forward(x, w, b)

    # One-time parameter re-layout (transpose + bf16 cast + pad), reused below.
    prepared = prepare_classifier_params(w, b)

    # 1) Multi-tile grid (3 batch tiles x 3 class tiles after padding).
    logits, f = class_block_forward(x, prepared=prepared, tm=16, tc=128)
    jax.block_until_ready((logits, f))
    assert jnp.allclose(f, ref_f, atol=1e-5, rtol=1e-5)
    # bf16 MXU operands (f32 accumulate): slightly looser logits tolerance.
    assert jnp.allclose(logits, ref_logits, atol=5e-4, rtol=5e-3)

    # 2) Default tile selection path (single class tile -> weight loaded once).
    logits2, f2 = class_block_forward(x, prepared=prepared)
    jax.block_until_ready((logits2, f2))
    assert jnp.allclose(f2, ref_f, atol=1e-5, rtol=1e-5)
    assert jnp.allclose(logits2, ref_logits, atol=5e-4, rtol=5e-3)

    # 3) Convenience path that re-lays-out the weight per call.
    logits3, f3 = class_block_forward(x, w, b)
    jax.block_until_ready((logits3, f3))
    assert jnp.allclose(f3, ref_f, atol=1e-5, rtol=1e-5)
    assert jnp.allclose(logits3, ref_logits, atol=5e-4, rtol=5e-3)

    print("KERNEL_OK")
</pallas_src>

<mosaic_0001>
module attributes {stable_mosaic.version = 11 : i64} {
  func.func @classblock_kernel(%arg0: i32, %arg1: i32, %arg2: memref<16x128xf32, #tpu.memory_space<vmem>>, %arg3: memref<128x128xbf16, #tpu.memory_space<vmem>>, %arg4: memref<1x128xf32, #tpu.memory_space<vmem>>, %arg5: memref<16x128xf32, #tpu.memory_space<vmem>>, %arg6: memref<16x128xf32, #tpu.memory_space<vmem>>, %arg7: memref<16x128xbf16, #tpu.memory_space<vmem>>) attributes {dimension_semantics = [#tpu.dimension_semantics<parallel>, #tpu.dimension_semantics<arbitrary>], iteration_bounds = array<i64: 3, 3>, scalar_prefetch = 0 : i64, scratch_operands = 1 : i64, tpu.core_type = #tpu.core_type<tc>, window_params = [{transform_indices = @transform_0, window_bounds = array<i64: 16, 128>}, {transform_indices = @transform_1, window_bounds = array<i64: 128, 128>}, {transform_indices = @transform_2, window_bounds = array<i64: 1, 128>}, {transform_indices = @transform_3, window_bounds = array<i64: 16, 128>}, {transform_indices = @transform_4, window_bounds = array<i64: 16, 128>}]} {
    %c0_i32 = arith.constant 0 : i32
    %0 = arith.cmpi eq, %arg1, %c0_i32 : i32
    %1 = arith.extui %0 : i1 to i32
    %c0_i32_0 = arith.constant 0 : i32
    %2 = arith.cmpi ne, %1, %c0_i32_0 : i32
    scf.if %2 {
      %c0_8 = arith.constant 0 : index
      %c0_9 = arith.constant 0 : index
      %10 = vector.load %arg2[%c0_8, %c0_9] : memref<16x128xf32, #tpu.memory_space<vmem>>, vector<16x128xf32>
      %11 = arith.mulf %10, %10 : vector<16x128xf32>
      %cst_10 = arith.constant dense<0.000000e+00> : vector<16xf32>
      %12 = vector.multi_reduction <add>, %11, %cst_10 [1] : vector<16x128xf32> to vector<16xf32>
      %13 = vector.shape_cast %12 : vector<16xf32> to vector<16x1xf32>
      %14 = math.sqrt %13 : vector<16x1xf32>
      %cst_11 = arith.constant 9.99999993E-9 : f32
      %15 = vector.broadcast %cst_11 : f32 to vector<16x1xf32>
      %16 = arith.addf %14, %15 : vector<16x1xf32>
      %17 = tpu.reciprocal %16 : vector<16x1xf32> -> vector<16x1xf32>
      %18 = vector.broadcast %17 : vector<16x1xf32> to vector<16x128xf32>
      %19 = arith.mulf %10, %18 : vector<16x128xf32>
      %c0_12 = arith.constant 0 : index
      %c0_13 = arith.constant 0 : index
      %20 = vector.load %arg6[%c0_12, %c0_13] : memref<16x128xf32, #tpu.memory_space<vmem>>, vector<16x128xf32>
      tpu.vector_store %arg6[%c0_12, %c0_13], %19 {strides = array<i32>} : memref<16x128xf32, #tpu.memory_space<vmem>>, vector<16x128xf32>,
      %21 = arith.truncf %10 : vector<16x128xf32> to vector<16x128xbf16>
      %c0_14 = arith.constant 0 : index
      %c0_15 = arith.constant 0 : index
      %22 = vector.load %arg7[%c0_14, %c0_15] : memref<16x128xbf16, #tpu.memory_space<vmem>>, vector<16x128xbf16>
      tpu.vector_store %arg7[%c0_14, %c0_15], %21 {strides = array<i32>} : memref<16x128xbf16, #tpu.memory_space<vmem>>, vector<16x128xbf16>,
    } else {
    }
    %c0 = arith.constant 0 : index
    %c0_1 = arith.constant 0 : index
    %3 = vector.load %arg7[%c0, %c0_1] : memref<16x128xbf16, #tpu.memory_space<vmem>>, vector<16x128xbf16>
    %c0_2 = arith.constant 0 : index
    %c0_3 = arith.constant 0 : index
    %4 = vector.load %arg3[%c0_2, %c0_3] : memref<128x128xbf16, #tpu.memory_space<vmem>>, vector<128x128xbf16>
    %cst = arith.constant dense<0.000000e+00> : vector<16x128xf32>
    %5 = tpu.matmul %3, %4, %cst {dimension_numbers = #tpu.dot_dimension_numbers<[1], [0], [0], [1], [0, 0, 1, 1], [], []>} : vector<16x128xbf16>, vector<128x128xbf16>, vector<16x128xf32> -> vector<16x128xf32>
    %c0_4 = arith.constant 0 : index
    %c0_5 = arith.constant 0 : index
    %6 = vector.load %arg4[%c0_4, %c0_5] : memref<1x128xf32, #tpu.memory_space<vmem>>, vector<1x128xf32>
    %7 = vector.broadcast %6 : vector<1x128xf32> to vector<16x128xf32>
    %8 = arith.addf %5, %7 : vector<16x128xf32>
    %c0_6 = arith.constant 0 : index
    %c0_7 = arith.constant 0 : index
    %9 = vector.load %arg5[%c0_6, %c0_7] : memref<16x128xf32, #tpu.memory_space<vmem>>, vector<16x128xf32>
    tpu.vector_store %arg5[%c0_6, %c0_7], %8 {strides = array<i32>} : memref<16x128xf32, #tpu.memory_space<vmem>>, vector<16x128xf32>,
    return
  }
  func.func @transform_0(%arg0: i32, %arg1: i32) -> (i32, i32) {
    %c0_i32 = arith.constant 0 : i32
    %c0_i32_0 = arith.constant 0 : i32
    return %arg0, %c0_i32 : i32, i32
  }
  func.func @transform_1(%arg0: i32, %arg1: i32) -> (i32, i32) {
    %c0_i32 = arith.constant 0 : i32
    %c0_i32_0 = arith.constant 0 : i32
    return %c0_i32, %arg1 : i32, i32
  }
  func.func @transform_2(%arg0: i32, %arg1: i32) -> (i32, i32) {
    %c0_i32 = arith.constant 0 : i32
    %c0_i32_0 = arith.constant 0 : i32
    return %c0_i32, %arg1 : i32, i32
  }
  func.func @transform_3(%arg0: i32, %arg1: i32) -> (i32, i32) {
    %c0_i32 = arith.constant 0 : i32
    return %arg0, %arg1 : i32, i32
  }
  func.func @transform_4(%arg0: i32, %arg1: i32) -> (i32, i32) {
    %c0_i32 = arith.constant 0 : i32
    %c0_i32_0 = arith.constant 0 : i32
    return %arg0, %c0_i32 : i32, i32
  }
}

</mosaic_0001>

<bundles_post_ra>
// kernel: tpu_custom_call.1
= control target key start
LH: loop header
LB: loop body
LE: loop exit
PB: predicated region body
PF: predicated region fallthrough
CT: control target
= control target key end

     0   :  { %s1539_s0 = inlined_call_operand.hbm [shape: f32[48,128], index: 0, kind: input, shape index: {}]   ;;  %s1540_s1 = inlined_call_operand.hbm [shape: bf16[128,384], index: 1, kind: input, shape index: {}]   ;;  %s1541_s2 = inlined_call_operand.vmem [shape: f32[1,384], index: 2, kind: input, shape index: {}]   ;;  %s1542_s3 = inlined_call_operand.hbm [shape: f32[48,384], index: 3, kind: output, shape index: {0}]   ;;  %s1543_s4 = inlined_call_operand.hbm [shape: f32[48,128], index: 4, kind: output, shape index: {1}]  }
   0x1   :  { %1566 = sst [smem:[#allocation29_spill]] %s1539_s0 }
   0x2   :  { %1567 = sst [smem:[#allocation30_spill]] %s1540_s1 }
   0x3   :  { %1568 = sst [smem:[#allocation31_spill]] %s1541_s2 }
   0x4   :  { %1569 = sst [smem:[#allocation32_spill]] %s1542_s3 }
   0x5   :  { %1570 = sst [smem:[#allocation33_spill]] %s1543_s4 }
   0x6   :  { %10 = vsyncpa [#allocation4], 0 }
   0x7   :  { %12 = vsyncpa [#allocation4 + $0x1], 0 }
   0x8   :  { %13 = vsyncpa [#allocation7], 0 }
   0x9   :  { %15 = vsyncpa [#allocation7 + $0x1], 0 }
   0xa   :  { %16 = vsyncpa [#allocation5], 0 }
   0xb   :  { %18 = vsyncpa [#allocation5 + $0x1], 0 }
   0xc   :  { %19 = vsyncpa [#allocation10], 0 }
   0xd   :  { %21 = vsyncpa [#allocation10 + $0x1], 0  ;;  %s1164_s15 = smov 0   ;;  %s1166_s16 = smov 0  }
   0xe   :  { %s1168_s17 = smov 0   ;;  %s1170_s18 = smov 0  }
   0xf   :  { %s1172_s19 = smov 0   ;;  %s1174_s20 = smov 0  }
  0x10   :  { %s1176_s21 = smov 0   ;;  %s1178_s22 = smov 0  }
  0x11   :  { %s1180_s23 = smov 0   ;;  %s1182_s24 = smov 0  }
  0x12   :  { %s1184_s25 = smov 0   ;;  %s1186_s26 = smov 0  }
  0x13   :  { %s1188_s27 = smov 0   ;;  %s1190_s28 = smov 0  }
  0x14 LB: > { %1571 = sst [smem:[#allocation15_spill]] %s1071_s15  ;;  %s651_s29 = sadd.s32 4294967295, %s1123_s28   ;;  %s1123_s28 = sphi %s1190_s28, %s27_s28   ;;  %s1119_s27 = sphi %s1188_s27, %s1630_s27   ;;  %s1115_s26 = sphi %s1186_s26, %s1629_s26   ;;  %s1111_s25 = sphi %s1184_s25, %s1628_s25   ;;  %s1107_s24 = sphi %s1182_s24, %s1627_s24   ;;  %s1103_s23 = sphi %s1180_s23, %s1638_s23   ;;  %s1099_s22 = sphi %s1178_s22, %s1637_s22   ;;  %s1095_s21 = sphi %s1176_s21, %s1636_s21   ;;  %s1091_s20 = sphi %s1174_s20, %s1635_s20   ;;  %s1087_s19 = sphi %s1172_s19, %s1634_s19   ;;  %s1083_s18 = sphi %s1170_s18, %s1633_s18   ;;  %s1079_s17 = sphi %s1168_s17, %s1632_s17   ;;  %s1075_s16 = sphi %s1166_s16, %s1631_s16   ;;  %s1071_s15 = sphi %s1164_s15, %s1625_s15  }
  0x15   : > { %1572 = sst [smem:[#allocation16_spill]] %s1075_s16  ;;  %s652_s30 = sadd.s32 4294967294, %s1123_s28  }
  0x16   : > { %1573 = sst [smem:[#allocation17_spill]] %s1095_s21  ;;  %p53_p0 = scmp.ne.s32.totalorder %s1103_s23, %s1099_s22 }
  0x17   : > { %1574 = sst [smem:[#allocation18_spill]] %s1107_s24  ;;  %p1544_p1 = scmp.eq.s32.totalorder %s1123_s28, 0 }
  0x18   : > { %1575 = sst [smem:[#allocation19_spill]] %s1111_s25  ;;  %p59_p2 = scmp.ne.s32.totalorder %s1099_s22, %s1095_s21 }
  0x19   : > { %1576 = sst [smem:[#allocation20_spill]] %s1115_s26  ;;  %p1243_p3 = scmp.eq.s32.totalorder %s651_s29, 0 }
  0x1a   : > { %1577 = sst [smem:[#allocation21_spill]] %s1119_s27  ;;  %p1249_p4 = por %p1544_p1, %p53_p0 }
  0x1b   : > { %p136_p5 = scmp.ne.s32.totalorder %s1079_s17, %s1075_s16  ;;  %p1257_p6 = por %p1243_p3, %p59_p2 }
  0x1c   : > { %p137_p7 = scmp.eq.s32.totalorder %s651_s29, 8  ;;  %p142_p8 = scmp.ne.s32.totalorder %s1075_s16, %s1071_s15 }
  0x1d   : > { %p143_p9 = scmp.eq.s32.totalorder %s652_s30, 8  ;;  %p748_p1 = scmp.lt.s32.totalorder %s1123_s28, 9 }
  0x1e   : > { %p1263_p10 = por %p137_p7, %p136_p5  ;;  %p1267_p11 = por %p137_p7, %p53_p0 }
  0x1f   : > { %p1271_p12 = por %p143_p9, %p142_p8  ;;  %p1275_p13 = por %p143_p9, %p59_p2 }
  0x20   : > { %s1581_s10 = scalar_select %p1263_p10, 1, 0 }
  0x21   : > { %s1583_s11 = scalar_select %p1267_p11, 1, 0 }
  0x22   : > { %1582 = sst [smem:[#allocation22_spill]] %s1581_s10  ;;  %s189_s14 = sand.u32 1, %s1103_s23  }
  0x23   : > { %1584 = sst [smem:[#allocation23_spill]] %s1583_s11  ;;  %s687_s29 = sshll.u32 %s1119_s27, 8 }
  0x24   : > { %s1585_s12 = scalar_select %p1271_p12, 1, 0 }
  0x25   : > { %s1587_s13 = scalar_select %p1275_p13, 1, 0 }
  0x26   : > { %1586 = sst [smem:[#allocation24_spill]] %s1585_s12  ;;  %s655_s30 = sshll.u32 %s189_s14, 4 }
  0x27   : > { %1588 = sst [smem:[#allocation25_spill]] %s1587_s13  ;;  %s193_s15 = scalar_lea.vmem [#allocation3], %s655_s30 }
  0x28   : > { %s1589_s0 = sld [smem:[#allocation29_spill]]  ;;  %s200_s3 = sshll.u32 %s193_s15, 4  ;;  %s201_s3 = int_to_ptr.vmem [resolvable:$true] %s200_s3 }
  0x29   : > { %p1289_p0 = pnand %p748_p1, %p1249_p4  ;;  %s190_s12 = scalar_lea.sflag [#allocation4], %s189_s14 }
  0x2a   : > { %s902_s13 = scalar_lea.vmem %s201_s3, 256  ;;  %s1125_s4 = smov [#allocation3]  }
  0x2b   : > { %p891_p2 = pneg %p1289_p0  ;;  %p903_p5 = scmp.ne.s32.totalorder %s201_s3, %s902_s13 }
  0x2c   : > { %s907_s5 = sshll.u32 %s1125_s4, 4  ;;  %s908_s5 = int_to_ptr.vmem [resolvable:$false] %s907_s5 }
  0x2d   : > { %p905_p7 = pnand %p903_p5, %p891_p2  ;;  %s909_s6 = scalar_lea.vmem %s908_s5, 512 }
  0x2e   : > { %s199_s21 = scalar_lea.hbm %s1589_s0, %s687_s29  ;;  %p910_p9 = scmp.lt.s32.totalorder %s201_s3, %s908_s5 }
  0x2f   : > { %p906_p8 = pneg %p905_p7  ;;  %p911_p13 = scmp.lt.s32.totalorder %s909_s6, %s902_s13 }
  0x31   : > { %p912_p12 = por %p911_p13, %p910_p9 }
  0x33   : > { %p913_p4 = pnand %p912_p12, %p906_p8 }
  0x35   : > { %916 = shalt.err (!%p913_p4)
}
  0x36   : > { %s1126_s15 = smov 128   ;;  %s1127_s4 = smov 8  }
  0x37   : > { %737 = dma.hbm_to_vmem [thread:$0]  (!%p1289_p0), %s199_s21, 256, %s201_s3, %s190_s12, %s1126_s15, %s1126_s15, %s1127_s4  }
  0x38   : > { %p660_p12 = scmp.ge.s32.totalorder %s1123_s28, 1  ;;  %p234_p13 = scmp.lt.s32.totalorder %s1123_s28, 10 }
  0x39   : > { %s36_s13 = sadd.s32 1, %s1115_s26  ;;  %s72_s14 = sadd.s32 1, %s1091_s20 }
  0x3a   : > { %p1299_p2 = pnand %p660_p12, %p234_p13  ;;  %p37_p5 = scmp.ge.s32.totalorder %s36_s13, 3 }
  0x3b   : > { %p79_p7 = scmp.ne.s32.totalorder %s1091_s20, %s1087_s19  ;;  %p85_p8 = scmp.ne.s32.totalorder %s1087_s19, %s1083_s18 }
  0x3c   : > { %s1640_s13 = smov (%p37_p5, %s36_s13), 0  ;;  %s1593_s3 = sadd.s32 1, %s1119_s27 }
  0x3d   : > { %1592 = sst [smem:[#allocation26_spill]] %s1640_s13  ;;  %s1642_s3 = smov (!%p37_p5, %s1593_s3), %s1119_s27 }
  0x3e   : > { %s69_s21 = ssub.s32 %s1115_s26, %s1640_s13  ;;  %p1594_p0 = scmp.eq.s32.totalorder %s1123_s28, 0 }
  0x3f   : > { %p41_p4 = scmp.ge.s32.totalorder %s1642_s3, 3  ;;  %p70_p12 = scmp.eq.s32.totalorder %s69_s21, 0 }
  0x40   : > { %p1318_p9 = por %p79_p7, %p1594_p0  ;;  %p1324_p13 = por %p85_p8, %p1243_p3 }
  0x41   : > { %s126_s12 = sadd.s32 1, %s1079_s17  ;;  %s1644_s3 = smov (%p41_p4, %s1642_s3), 0 }
  0x42   : > { %1597 = sst [smem:[#allocation27_spill]] %s1644_s3  ;;  %s43_s30 = ssub.s32 %s1119_s27, %s1644_s3 }
  0x43   : > { %s1332_s29 = scalar_select %p70_p12, %s1091_s20, %s72_s14  }
  0x44   : > { %s210_s5 = sand.u32 1, %s1091_s20   ;;  %p44_p5 = scmp.eq.s32.totalorder %s43_s30, 0 }
  0x45   : > { %s123_s6 = sor.u32 %s69_s21, %s43_s30  ;;  %s1598_s15 = sadd.s32 1, %s1103_s23 }
  0x46   : > { %p124_p7 = scmp.eq.s32.totalorder %s123_s6, 0  ;;  %s658_s0 = sshll.u32 %s210_s5, 6 }
  0x47   : > { %s1340_s4 = scalar_select %p44_p5, %s1103_s23, %s1598_s15  }
  0x48   : > { %s1343_s7 = scalar_select %p124_p7, %s1079_s17, %s126_s12  }
  0x49   : > { %1599 = sst [smem:[#allocation28_spill]] %s1340_s4  ;;  %s659_s13 = sshll.u32 %s1115_s26, 6 }
  0x4a   : > { %s1600_s1 = sld [smem:[#allocation30_spill]]  ;;  %s214_s24 = scalar_lea.vmem [#allocation6], %s658_s0 }
  0x4b   : > { %s220_s16 = sshll.u32 %s214_s24, 4  ;;  %p1353_p3 = pnand %p748_p1, %p1318_p9  ;;  %s221_s16 = int_to_ptr.vmem [resolvable:$true] %s220_s16 }
  0x4c   : > { %s211_s21 = scalar_lea.sflag [#allocation7], %s210_s5  ;;  %s930_s12 = scalar_lea.vmem %s221_s16, 1024 }
  0x4d   : > { %p919_p8 = pneg %p1353_p3  ;;  %p931_p0 = scmp.ne.s32.totalorder %s221_s16, %s930_s12 }
  0x4e   : > { %s1128_s30 = smov [#allocation6]  }
  0x4f   : > { %p933_p4 = pnand %p931_p0, %p919_p8  ;;  %s935_s25 = sshll.u32 %s1128_s30, 4  ;;  %s936_s25 = int_to_ptr.vmem [resolvable:$false] %s935_s25 }
  0x50   : > { %s219_s2 = scalar_lea.hbm %s1600_s1, %s659_s13  ;;  %s937_s0 = scalar_lea.vmem %s936_s25, 2048 }
  0x51   : > { %p934_p12 = pneg %p933_p4  ;;  %p938_p5 = scmp.lt.s32.totalorder %s221_s16, %s936_s25 }
  0x52   : > { %p939_p7 = scmp.lt.s32.totalorder %s937_s0, %s930_s12 }
  0x54   : > { %p940_p10 = por %p939_p7, %p938_p5 }
  0x56   : > { %p941_p1 = pnand %p940_p10, %p934_p12 }
  0x58   : > { %944 = shalt.err (!%p941_p1)
}
  0x59   : > { %s1129_s24 = smov 192   ;;  %s1130_s11 = smov 64  }
  0x5a   : > { %s1131_s13 = smov 4   ;;  %238 = sbr.rel (%p1299_p2) target bundleno = 543 (0x21f), region = 32 }
  0x5b   : > { %740 = dma.hbm_to_vmem [thread:$0]  (!%p1353_p3), %s219_s2, 1024, %s221_s16, %s211_s21, %s1129_s24, %s1130_s11, %s1131_s13  }
  0x5c   : > { %s1364_s10 = sand.u32 (!%p1299_p2), 1, %s1099_s22  }
  0x5d   : > { %s661_s5 = sshll.u32 (!%p1299_p2), %s1364_s10, 4  ;;  %s241_s6 = scalar_lea.sflag (!%p1299_p2), [#allocation4], %s1364_s10 }
  0x5e   : > { %s244_s15 = scalar_lea.vmem (!%p1299_p2), [#allocation3], %s661_s5 }
  0x5f   : > { %1054 = dma.done.wait (%p1257_p6), %s241_s6, 256  }
  0x60   : > { %1056 = vsyncadd (%p1257_p6), %s241_s6, 4294967040  ;;  %s249_s2 = sand.u32 1, %s1087_s19  }
  0x61   : > { %s662_s16 = sshll.u32 %s249_s2, 6  ;;  %s250_s8 = scalar_lea.sflag [#allocation7], %s249_s2 }
  0x62   : > { %s1373_s14 = scalar_lea.vmem [#allocation6], %s662_s16 }
  0x63   : > { %1058 = dma.done.wait (%p1324_p13), %s250_s8, 1024  }
  0x64   : > { %1060 = vsyncadd (%p1324_p13), %s250_s8, 4294966272  ;;  %s1602_s21 = sld [smem:[#allocation16_spill]]  ;;  %s1392_s2 = scalar_lea.vmem [#allocation9], %s661_s5 }
  0x65   : > { %s1603_s12 = sld [smem:[#allocation18_spill]] }
  0x6a   : > { %s1561_s30 = sand.u32 1, %s1602_s21  }
  0x6b   : > { %s663_s9 = sshll.u32 %s1561_s30, 4  ;;  %p292_p6 = scmp.lt.s32.totalorder %s1603_s12, 2 }
  0x6c   : > { %s1390_s6 = scalar_lea.vmem [#allocation8], %s663_s9  ;;  %p665_p10 = scmp.ne.s32.totalorder %s1603_s12, 0 }
  0x6d   : > { %s1384_s25 = scalar_select %p292_p6, %s1603_s12, 2 }
  0x6e   : > { %301 = sbr.rel (%p665_p10) target bundleno = 297 (0x129), region = 44 }
  0x73   : > { %v302_v0 = vld [vmem:[%s244_s15] sm:$0xff]  ;;  %v303_v1 = vld [vmem:[%s244_s15 + $0x8] sm:$0xff] }
  0x74   : > { %v304_v2 = vmul.f32 %v302_v0, %v302_v0  ;;  %v694_v3 = vpack.c.bf16 %v303_v1, %v302_v0  ;;  %v305_v4 = vmul.f32 %v303_v1, %v303_v1 }
  0x76   : > { %306 = vadd.xlane.f32.xlu0 %v304_v2  ;;  %695 = vst [vmem:[#allocation2] sm:$0xff] %v694_v3  }
  0x7a   : > { %308 = vadd.xlane.f32.xlu0 %v305_v4 }
  0xff   : > { %v307_v5 = vpop.xlane.xlu0 %306 }
 0x100   : > { %872 = vrsqrt.f32 %v307_v5  ;;  %vm312_vm0 = vcmp.eq.f32.partialorder %v307_v5, inf  ;;  %v315_v9 = vand.u32 2147483648, %v307_v5  ;;  %vm314_vm1 = vcmp.eq.f32.partialorder %v307_v5, 0.0 }
 0x103   : > { %v309_v6 = vpop.xlane.xlu0 %308 }
 0x104   : > { %874 = vrsqrt.f32 %v309_v6  ;;  %vm319_vm2 = vcmp.eq.f32.partialorder %v309_v6, inf  ;;  %v322_v15 = vand.u32 2147483648, %v309_v6  ;;  %vm321_vm3 = vcmp.eq.f32.partialorder %v309_v6, 0.0 }
 0x10d   : > { %v873_v7 = vpop.eup %872 }
 0x10e   : > { %v311_v8 = vmul.f32 %v873_v7, %v307_v5 }
 0x110   : > { %v313_v10 = vsel %vm312_vm0, %v307_v5, %v311_v8 }
 0x111   : > { %v875_v11 = vpop.eup %874  ;;  %v316_v12 = vsel %vm314_vm1, %v315_v9, %v313_v10 }
 0x112   : > { %v324_v13 = vadd.f32 1e-08, %v316_v12  ;;  %v318_v14 = vmul.f32 %v875_v11, %v309_v6 }
 0x114   : > { %876 = vrcp.f32 %v324_v13  ;;  %v320_v16 = vsel %vm319_vm2, %v309_v6, %v318_v14 }
 0x115   : > { %v323_v17 = vsel %vm321_vm3, %v322_v15, %v320_v16 }
 0x116   : > { %v325_v18 = vadd.f32 1e-08, %v323_v17 }
 0x118   : > { %878 = vrcp.f32 %v325_v18 }
 0x121   : > { %v877_v19 = vpop.eup %876 }
 0x122   : > { %v328_v20 = vmul.f32 %v877_v19, %v302_v0 }
 0x124   : > { %330 = vst [vmem:[%s1392_s2] sm:$0xff] %v328_v20 }
 0x125   : > { %v879_v21 = vpop.eup %878 }
 0x126   : > { %v329_v22 = vmul.f32 %v879_v21, %v303_v1 }
 0x128   : > { %331 = vst [vmem:[%s1392_s2 + $0x8] sm:$0xff] %v329_v22 }
 0x129 PF: > { %v880_v23 = vld [vmem:[%s1373_s14 + $0x38] sm:$0xff]   ;;  %v1132_v24 = vmov 0.0   ;;  %v881_v25 = vld [vmem:[%s1373_s14 + $0x30] sm:$0xff]   ;;  %vm1133_vm4 = vmmov 0   ;;  %v882_v26 = vld [vmem:[%s1373_s14 + $0x28] sm:$0xff]   ;;  %s1605_s18 = sld [smem:[#allocation19_spill]] }
 0x12a   : > { %705 = vmatprep.subr.bf16.mxu0 %v1132_v24  ;;  %721 = vmatprep.mubr.msk.bf16.mxu0 %vm1133_vm4, %v1132_v24  ;;  %v883_v27 = vld [vmem:[%s1373_s14 + $0x20] sm:$0xff]   ;;  %v884_v28 = vld [vmem:[%s1373_s14 + $0x18] sm:$0xff]   ;;  %v885_v29 = vld [vmem:[%s1373_s14 + $0x10] sm:$0xff]   ;;  %s1607_s21 = sld [smem:[#allocation33_spill]]  ;;  %s501_s0 = sshll.u32 %s1392_s2, 4  ;;  %s1412_s0 = int_to_ptr.vmem [resolvable:$true] %s501_s0 }
 0x12b   : > { %706 = vmatpush3.bf16.msra.mxu0 %v880_v23  ;;  %v886_v30 = vld [vmem:[%s1373_s14 + $0x8] sm:$0xff]   ;;  %v887_v31 = vld [vmem:[%s1373_s14] sm:$0xff]   ;;  %v888_v32 = vld [vmem:[#allocation2] sm:$0xff]   ;;  %s470_s24 = scalar_lea.sflag [#allocation10], %s1364_s10  ;;  %s945_s11 = scalar_lea.vmem %s1412_s0, 256 }
 0x12c   : > { %707 = vmatprep.subr.bf16.mxu0 %v1132_v24  ;;  %p946_p2 = scmp.ne.s32.totalorder %s1412_s0, %s945_s11  ;;  %s1134_s14 = smov [#allocation9]  }
 0x12d   : > { %s949_s30 = sshll.u32 %s1134_s14, 4  ;;  %s950_s30 = int_to_ptr.vmem [resolvable:$false] %s949_s30 }
 0x12e   : > { %p947_p9 = pnand %p946_p2, %p1267_p11  ;;  %s951_s13 = scalar_lea.vmem %s950_s30, 512 }
 0x12f   : > { %708 = vmatpush3.bf16.msra.mxu0 %v881_v25  ;;  %s690_s15 = sshll.u32 %s1605_s18, 8  ;;  %p952_p3 = scmp.lt.s32.totalorder %s1412_s0, %s950_s30 }
 0x130   : > { %709 = vmatprep.subr.bf16.mxu0 %v1132_v24  ;;  %s1608_s12 = smov %s1607_s21  ;;  %s1409_s9 = scalar_lea.hbm %s1607_s21, %s690_s15 }
 0x131   : > { %p948_p13 = pneg %p947_p9  ;;  %p953_p8 = scmp.lt.s32.totalorder %s951_s13, %s945_s11 }
 0x133   : > { %710 = vmatpush3.bf16.msra.mxu0 %v882_v26  ;;  %p954_p0 = por %p953_p8, %p952_p3 }
 0x134   : > { %711 = vmatprep.subr.bf16.mxu0 %v1132_v24 }
 0x135   : > { %p955_p4 = pnand %p954_p0, %p948_p13 }
 0x137   : > { %712 = vmatpush3.bf16.msra.mxu0 %v883_v27 }
 0x138   : > { %713 = vmatprep.subr.bf16.mxu0 %v1132_v24 }
 0x13b   : > { %714 = vmatpush3.bf16.msra.mxu0 %v884_v28 }
 0x13c   : > { %715 = vmatprep.subr.bf16.mxu0 %v1132_v24 }
 0x13f   : > { %716 = vmatpush3.bf16.msra.mxu0 %v885_v29 }
 0x140   : > { %717 = vmatprep.subr.bf16.mxu0 %v1132_v24 }
 0x143   : > { %718 = vmatpush3.bf16.msra.mxu0 %v886_v30 }
 0x144   : > { %719 = vmatprep.subr.bf16.mxu0 %v1132_v24 }
 0x147   : > { %720 = vmatpush3.bf16.msra.mxu0 %v887_v31 }
 0x14a   : > { %722 = vmatmul.mubr.bf16.vlgmr.msra.gmra.mxu0 %v888_v32 }
 0x14b   : > { %958 = shalt.err (!%p955_p4)
}
 0x14c   : > { %s959_s2 = scalar_lea.hbm %s1409_s9, 256  ;;  %s963_s8 = scalar_lea.hbm %s1608_s12, 768 }
 0x14d   : > { %p960_p12 = scmp.ne.s32.totalorder %s1409_s9, %s959_s2  ;;  %p964_p1 = scmp.lt.s32.totalorder %s1409_s9, %s1608_s12 }
 0x14e   : > { %p965_p6 = scmp.lt.s32.totalorder %s963_s8, %s959_s2 }
 0x14f   : > { %p961_p5 = pnand %p960_p12, %p1267_p11 }
 0x150   : > { %p966_p10 = por %p965_p6, %p964_p1 }
 0x151   : > { %p962_p7 = pneg %p961_p5 }
 0x153   : > { %p967_p2 = pnand %p966_p10, %p962_p7 }
 0x155   : > { %970 = shalt.err (!%p967_p2)
}
 0x156   : > { %s1135_s30 = smov 128   ;;  %s1609_s13 = sld [smem:[#allocation18_spill]] }
 0x157   : > { %s1136_s11 = smov 8   ;;  %s1610_s2 = sld [smem:[#allocation16_spill]] }
 0x158   : > { %731 = dma.vmem_to_hbm [thread:$0]  (%p1267_p11), %s1412_s0, 256, %s1409_s9, %s470_s24, %s1135_s30, %s1135_s30, %s1136_s11  }
 0x159   : > { %s725_s15 = smul.u32 6, %s1605_s18  ;;  %s1611_s21 = sld [smem:[#allocation31_spill]] }
 0x15a   : > { %s1613_s12 = sld [smem:[#allocation22_spill]]  ;;  %s485_s5 = sshll.u32 %s1390_s6, 4  ;;  %s1454_s5 = int_to_ptr.vmem [resolvable:$true] %s485_s5 }
 0x15b   : > { %s1614_s26 = sld [smem:[#allocation32_spill]]  ;;  %s1137_s0 = smov [#allocation8]  }
 0x15c   : > { %s482_s1 = sadd.s32 %s1609_s13, %s725_s15  ;;  %s975_s27 = sshll.u32 %s1137_s0, 4  ;;  %s976_s27 = int_to_ptr.vmem [resolvable:$false] %s975_s27 }
 0x15d   : > { %s682_s3 = sshll.u32 %s482_s1, 7  ;;  %s971_s1 = scalar_lea.vmem %s1454_s5, 256 }
 0x15e   : > { %p972_p11 = scmp.ne.s32.totalorder %s1454_s5, %s971_s1  ;;  %p978_p8 = scmp.lt.s32.totalorder %s1454_s5, %s976_s27 }
 0x15f   : > { %s1612_s14 = scalar_lea.vmem %s1611_s21, %s1384_s25  ;;  %s1616_s25 = sand.u32 1, %s1610_s2  }
 0x160   : > { %v668_v33 = vld [vmem:[%s1612_s14] ss:$0 sm:$0xff]  ;;  %s1459_s18 = scalar_lea.sflag [#allocation5], %s1616_s25  ;;  %p1617_p9 = scmp.ne.s32.totalorder %s1613_s12, 0 }
 0x161   : > { %s1615_s4 = smov %s1614_s26  ;;  %s1452_s9 = scalar_lea.hbm %s1614_s26, %s682_s3 }
 0x162   : > { %p973_p13 = pnand %p972_p11, %p1617_p9  ;;  %s977_s26 = scalar_lea.vmem %s976_s27, 512 }
 0x163   : > { %p979_p0 = scmp.lt.s32.totalorder %s977_s26, %s971_s1 }
 0x164   : > { %p974_p3 = pneg %p973_p13 }
 0x165   : > { %p980_p4 = por %p979_p0, %p978_p8 }
 0x167   : > { %p981_p12 = pnand %p980_p4, %p974_p3 }
 0x20a   : > { %v455_v34 = vpop.f32.mrf.mxu0 }
 0x20b   : > { %v456_v35 = vadd.f32 %v668_v33, %v455_v34 }
 0x20c   : > { %v723_v36 = vpop.f32.mrf.mxu0 }
 0x20d   : > { %462 = vst [vmem:[%s1390_s6] sm:$0xff] %v456_v35 }
 0x20e   : > { %v458_v37 = vpop.f32.mrf.mxu0 }
 0x20f   : > { %v459_v38 = vadd.f32 %v668_v33, %v458_v37 }
 0x210   : > { %v724_v39 = vpop.f32.mrf.mxu0 }
 0x211   : > { %463 = vst [vmem:[%s1390_s6 + $0x8] sm:$0xff] %v459_v38 }
 0x212   : > { %984 = shalt.err (!%p981_p12)
}
 0x213   : > { %s985_s3 = scalar_lea.hbm %s1452_s9, 256  ;;  %s989_s13 = scalar_lea.hbm %s1615_s4, 2304 }
 0x214   : > { %p986_p5 = scmp.ne.s32.totalorder %s1452_s9, %s985_s3  ;;  %p990_p6 = scmp.lt.s32.totalorder %s1452_s9, %s1615_s4 }
 0x215   : > { %p991_p10 = scmp.lt.s32.totalorder %s989_s13, %s985_s3 }
 0x216   : > { %p987_p7 = pnand %p986_p5, %p1617_p9 }
 0x217   : > { %p992_p2 = por %p991_p10, %p990_p6 }
 0x218   : > { %p988_p1 = pneg %p987_p7 }
 0x21a   : > { %p993_p11 = pnand %p992_p2, %p988_p1 }
 0x21c   : > { %996 = shalt.err (!%p993_p11)
}
 0x21d   : > { %s1138_s16 = smov 384  }
 0x21e   : > { %730 = dma.vmem_to_hbm [thread:$0]  (%p1617_p9), %s1454_s5, 256, %s1452_s9, %s1459_s18, %s1135_s30, %s1138_s16, %s1136_s11  }
 0x21f PF: > { %s1618_s8 = sld [smem:[#allocation15_spill]]  ;;  %p749_p13 = scmp.ge.s32.totalorder %s1123_s28, 2 }
 0x220   : > { %s1619_s21 = sld [smem:[#allocation24_spill]] }
 0x225   : > { %s516_s14 = sand.u32 1, %s1618_s8  }
 0x226   : > { %p1620_p3 = scmp.ne.s32.totalorder %s1619_s21, 0  ;;  %s517_s10 = scalar_lea.sflag [#allocation5], %s516_s14 }
 0x228   : > { %p742_p8 = pnand %p749_p13, %p1620_p3 }
 0x22a   : > { %p743_p0 = pneg %p742_p8 }
 0x22c   : > { %1062 = dma.done.wait (%p743_p0), %s517_s10, 256  }
 0x22d   : > { %1064 = vsyncadd (%p743_p0), %s517_s10, 4294967040  ;;  %s1621_s25 = sld [smem:[#allocation17_spill]] }
 0x22e   : > { %s1622_s12 = sld [smem:[#allocation25_spill]] }
 0x233   : > { %s525_s1 = sand.u32 1, %s1621_s25  }
 0x234   : > { %p1623_p4 = scmp.ne.s32.totalorder %s1622_s12, 0  ;;  %s526_s0 = scalar_lea.sflag [#allocation10], %s525_s1 }
 0x236   : > { %p745_p12 = pnand %p749_p13, %p1623_p4 }
 0x238   : > { %p746_p5 = pneg %p745_p12 }
 0x23a   : > { %1066 = dma.done.wait (%p746_p5), %s526_s0, 256  }
 0x23b   : > { %1068 = vsyncadd (%p746_p5), %s526_s0, 4294967040  ;;  %s27_s28 = sadd.s32 1, %s1123_s28   ;;  %s1625_s15 = sld [smem:[#allocation16_spill]] }
 0x23c   : > { %p1492_p9 = scmp.ge.s32.totalorder %s27_s28, 11   ;;  %s1626_s11 = sld [smem:[#allocation28_spill]] }
 0x23d   : > { %s1627_s24 = sld [smem:[#allocation20_spill]]  ;;  %s1631_s16 = smov %s1079_s17 }
 0x23e   : > { %s1628_s25 = sld [smem:[#allocation21_spill]]  ;;  %s1632_s17 = smov %s1343_s7 }
 0x23f   : > { %s1629_s26 = sld [smem:[#allocation26_spill]]  ;;  %s1633_s18 = smov %s1087_s19 }
 0x240   : > { %s1630_s27 = sld [smem:[#allocation27_spill]]  ;;  %s1634_s19 = smov %s1091_s20 }
 0x241   : > { %s1635_s20 = smov %s1332_s29  ;;  %s1636_s21 = smov %s1099_s22 }
 0x242   : > { %s1637_s22 = smov %s1103_s23  ;;  %s1638_s23 = smov %s1626_s11 }
 0x243   :  { %26 = sbr.rel (!%p1492_p9) target bundleno = 20 (0x14), region = 114 }
 0x248   :  { %531 = vsyncpa [#allocation4], 1 }
 0x249   :  { %533 = vsyncpa [#allocation4 + $0x1], 1 }
 0x24a   :  { %534 = vsyncpa [#allocation7], 1 }
 0x24b   :  { %536 = vsyncpa [#allocation7 + $0x1], 1 }
 0x24c   :  { %537 = vsyncpa [#allocation5], 1 }
 0x24d   :  { %539 = vsyncpa [#allocation5 + $0x1], 1 }
 0x24e   :  { %540 = vsyncpa [#allocation10], 1 }
 0x24f   :  { %542 = vsyncpa [#allocation10 + $0x1], 1 }

</bundles_post_ra>
